<compile_context>
chip_gen: v7x
topology: tpu7x:2x2x1
jax: 0.10.0
libtpu: 0.0.40
codegen_flags: <defaults>
</compile_context>

<pallas_src>
import functools

import jax
import jax.numpy as jnp
import numpy as np
from jax import lax
from jax.experimental import pallas as pl
from jax.experimental.pallas import tpu as pltpu


def _poly_epilogue(coeffs_ref, bias_ref, x, y, x_sq, y_sq, o_ref, degree):
    # MXU matmul on native-dtype operands, f32 accumulation.
    xy_raw = jnp.einsum('gmd,gdn->gmn', x, y,
                        preferred_element_type=jnp.float32)       # (G, TM, TN)
    inv_x = lax.rsqrt(x_sq)                                       # (G, TM, 1)
    inv_y = lax.rsqrt(y_sq)                                       # (G, 1, TN)
    xy = xy_raw * inv_x * inv_y          # broadcast muls only, no tile divide
    norm_prod = (x_sq * inv_x) * (y_sq * inv_y)        # = |x|*|y|, broadcast

    # Horner-style polynomial (degree is a static Python int).
    # TODO(synk): optionally run the Horner chain in bf16 on v6e/v7x when the
    # output dtype is bf16 (2x VPU throughput); not on v5e (no bf16 VPU).
    out = xy * coeffs_ref[0] + bias_ref[0]
    for d in range(1, degree):
        out = out * xy * coeffs_ref[d] + bias_ref[d]

    o_ref[...] = (out * norm_prod).astype(o_ref.dtype)


def _poly_body_fused(coeffs_ref, bias_ref, x_ref, y_ref, o_ref, *, degree):
    # Single-tile-per-(M,N) case: compute norms in-kernel (no redundancy).
    x = x_ref[...]
    y = y_ref[...]
    xf = x.astype(jnp.float32)
    yf = y.astype(jnp.float32)
    x_sq = jnp.sum(xf * xf, axis=-1, keepdims=True)               # (G, TM, 1)
    y_sq = jnp.sum(yf * yf, axis=-2, keepdims=True)               # (G, 1, TN)
    _poly_epilogue(coeffs_ref, bias_ref, x, y, x_sq, y_sq, o_ref, degree)


def _poly_body_precomputed(coeffs_ref, bias_ref, x_ref, y_ref, xsq_ref, ysq_ref,
                           o_ref, *, degree):
    # Multi-tile case: squared norms were precomputed once in XLA.
    _poly_epilogue(coeffs_ref, bias_ref, x_ref[...], y_ref[...],
                   xsq_ref[...], ysq_ref[...], o_ref, degree)


def polynomial_kernel(X, Y, coeffs, bias, *, out_dtype=None,
                      tm_target=512, tn_target=512):
    """X: (B, M, D), Y: (B, D, N), coeffs/bias: (degree,) -> (B, M, N)."""
    B, M, D = X.shape
    B2, D2, N = Y.shape
    assert B == B2 and D == D2
    degree = int(coeffs.shape[0])
    assert bias.shape[0] == degree
    if out_dtype is None:
        out_dtype = X.dtype

    x_bytes = X.dtype.itemsize
    y_bytes = Y.dtype.itemsize
    o_bytes = jnp.dtype(out_dtype).itemsize

    # ---- per-generation VMEM sizing -------------------------------------
    try:
        vmem_cap = pltpu.get_tpu_info().vmem_capacity_bytes
    except Exception:
        vmem_cap = 64 * 1024 * 1024                # assume smallest (v7x-like)
    if vmem_cap >= 96 * 1024 * 1024:               # v5e / v6e: 128 MiB physical
        vmem_limit = 100 * 1024 * 1024
        budget = 64 * 1024 * 1024
    else:                                          # v7x: 64 MiB per TensorCore
        vmem_limit = 44 * 1024 * 1024
        budget = 24 * 1024 * 1024

    def footprint(g_, tm_, tn_):
        # Double-buffered pipeline buffers (inputs + output + norm vectors).
        pipe = 2 * g_ * (tm_ * D * x_bytes + D * tn_ * y_bytes
                         + tm_ * tn_ * o_bytes + (tm_ + tn_) * 4)
        # Live f32 intermediates in the body (casts, xy_raw/xy/out/norm_prod).
        body = g_ * ((tm_ * D + D * tn_) * 4 + 6 * tm_ * tn_ * 4)
        return pipe + body

    # ---- tile selection: last two block dims must be (8,128)-multiples or
    #      equal to the full array extent. --------------------------------
    tm = M if M <= tm_target else tm_target        # tm_target multiple of 8
    tn = N if N <= tn_target else tn_target        # tn_target multiple of 128
    while footprint(1, tm, tn) > budget and (tm > 128 or tn > 128):
        if tm >= tn and tm > 128:
            tm = max(128, tm // 2)
        elif tn > 128:
            tn = max(128, tn // 2)
    # TODO(synk): for very large D, add an 'arbitrary' D grid axis with an f32
    # VMEM accumulator (pl.when init/finalize) instead of shrinking TM/TN.

    grid_m = pl.cdiv(M, tm)
    grid_n = pl.cdiv(N, tn)

    # ---- batch grouping: amortize ~0.35us/step overhead on tiny problems ---
    g = 1
    if M <= tm and N <= tn and B > 1:
        max_g_mem = max(1, budget // max(footprint(1, tm, tn), 1))
        # Keep >= 2 grid steps so both v7x TensorCores get work.
        max_g_steps = B if grid_m * grid_n >= 2 else max(1, B // 2)
        limit = min(max_g_mem, max_g_steps, B)
        for cand in range(limit, 0, -1):
            if B % cand == 0:
                g = cand
                break
    grid_b = B // g

    # ---- grid axis order: hold the larger operand, stream the smaller ------
    hold_y = (D * N) > (M * D)
    if hold_y:
        grid = (grid_b, grid_n, grid_m)
        x_map = lambda b, j, i: (b, i, 0)
        y_map = lambda b, j, i: (b, 0, j)
        o_map = lambda b, j, i: (b, i, j)
        xs_map = lambda b, j, i: (b, i, 0)
        ys_map = lambda b, j, i: (b, 0, j)
    else:
        grid = (grid_b, grid_m, grid_n)
        x_map = lambda b, i, j: (b, i, 0)
        y_map = lambda b, i, j: (b, 0, j)
        o_map = lambda b, i, j: (b, i, j)
        xs_map = lambda b, i, j: (b, i, 0)
        ys_map = lambda b, i, j: (b, 0, j)

    in_specs = [
        pl.BlockSpec(memory_space=pltpu.SMEM),                 # coeffs
        pl.BlockSpec(memory_space=pltpu.SMEM),                 # bias
        pl.BlockSpec((g, tm, D), x_map),                       # X tile
        pl.BlockSpec((g, D, tn), y_map),                       # Y tile
    ]
    args = [coeffs.astype(jnp.float32), bias.astype(jnp.float32), X, Y]

    # Recomputing norms inside every (i, j) tile is redundant once the (M, N)
    # plane spans more than one tile -> precompute squared norms once in XLA.
    use_precomputed = (grid_m > 1) or (grid_n > 1)
    if use_precomputed:
        x_sq = jnp.sum(jnp.square(X.astype(jnp.float32)), axis=-1, keepdims=True)
        y_sq = jnp.sum(jnp.square(Y.astype(jnp.float32)), axis=-2, keepdims=True)
        in_specs += [
            pl.BlockSpec((g, tm, 1), xs_map),                  # |x|^2 rows
            pl.BlockSpec((g, 1, tn), ys_map),                  # |y|^2 cols
        ]
        args += [x_sq, y_sq]
        kernel = functools.partial(_poly_body_precomputed, degree=degree)
    else:
        kernel = functools.partial(_poly_body_fused, degree=degree)

    grid_spec = pl.GridSpec(
        grid=grid,
        in_specs=in_specs,
        out_specs=pl.BlockSpec((g, tm, tn), o_map),
    )

    # TODO(synk): for tiny N, pack the g grouped batches side-by-side along the
    # lane axis (output slab (grid_b, M, g*N)) to get lane-dense unmasked stores.
    return pl.pallas_call(
        kernel,
        grid_spec=grid_spec,
        out_shape=jax.ShapeDtypeStruct((B, M, N), out_dtype),
        compiler_params=pltpu.CompilerParams(
            dimension_semantics=("parallel", "parallel", "parallel"),
            vmem_limit_bytes=vmem_limit),
    )(*args)


def _reference(X, Y, coeffs, bias):
    Xf = X.astype(jnp.float32)
    Yf = Y.astype(jnp.float32)
    X_norm = jnp.linalg.norm(Xf, axis=-1, keepdims=True)      # (B, M, 1)
    Y_norm = jnp.linalg.norm(Yf, axis=-2, keepdims=True)      # (B, 1, N)
    XY = jnp.einsum('bmd,bdn->bmn', Xf / X_norm, Yf / Y_norm)
    out = XY * coeffs[0] + bias[0]
    for d in range(1, coeffs.shape[0]):
        out = out * XY * coeffs[d] + bias[d]
    return out * X_norm * Y_norm


if __name__ == "__main__":
    key = jax.random.PRNGKey(0)
    kx, ky = jax.random.split(key)

    B, M, D, N = 2, 16, 32, 16
    degree = 3

    X = jax.random.normal(kx, (B, M, D), dtype=jnp.float32)
    Y = jax.random.normal(ky, (B, D, N), dtype=jnp.float32)

    # Deterministic params matching nn.Parameter(torch.ones(degree)/degree).
    coeffs = jnp.ones((degree,), dtype=jnp.float32) / degree
    bias = jnp.ones((degree,), dtype=jnp.float32) / degree

    out = polynomial_kernel(X, Y, coeffs, bias)
    out = jax.block_until_ready(out)

    ref = _reference(X, Y, coeffs, bias)
    assert out.shape == (B, M, N)
    # Tolerances slightly loosened: rsqrt-based normalization rounds differently
    # from normalize-then-matmul (algebraically identical).
    assert np.allclose(np.asarray(out), np.asarray(ref), rtol=1e-4, atol=1e-4)

    print("KERNEL_OK")
</pallas_src>

<mosaic_0001>
module attributes {stable_mosaic.version = 11 : i64} {
  func.func @_poly_body_fused(%arg0: i32, %arg1: i32, %arg2: i32, %arg3: memref<3xf32, #tpu.memory_space<smem>>, %arg4: memref<3xf32, #tpu.memory_space<smem>>, %arg5: memref<1x16x32xf32, #tpu.memory_space<vmem>>, %arg6: memref<1x32x16xf32, #tpu.memory_space<vmem>>, %arg7: memref<1x16x16xf32, #tpu.memory_space<vmem>>) attributes {dimension_semantics = [#tpu.dimension_semantics<parallel>, #tpu.dimension_semantics<parallel>, #tpu.dimension_semantics<parallel>], iteration_bounds = array<i64: 2, 1, 1>, scalar_prefetch = 0 : i64, scratch_operands = 0 : i64, tpu.core_type = #tpu.core_type<tc>, window_params = [{transform_indices = @transform_0, window_bounds = array<i64: 3>}, {transform_indices = @transform_1, window_bounds = array<i64: 3>}, {transform_indices = @transform_2, window_bounds = array<i64: 1, 16, 32>}, {transform_indices = @transform_3, window_bounds = array<i64: 1, 32, 16>}, {transform_indices = @transform_4, window_bounds = array<i64: 1, 16, 16>}]} {
    %c0 = arith.constant 0 : index
    %c0_0 = arith.constant 0 : index
    %c0_1 = arith.constant 0 : index
    %0 = vector.load %arg5[%c0, %c0_0, %c0_1] : memref<1x16x32xf32, #tpu.memory_space<vmem>>, vector<1x16x32xf32>
    %c0_2 = arith.constant 0 : index
    %c0_3 = arith.constant 0 : index
    %c0_4 = arith.constant 0 : index
    %1 = vector.load %arg6[%c0_2, %c0_3, %c0_4] : memref<1x32x16xf32, #tpu.memory_space<vmem>>, vector<1x32x16xf32>
    %2 = arith.mulf %0, %0 : vector<1x16x32xf32>
    %cst = arith.constant dense<0.000000e+00> : vector<1x16xf32>
    %3 = vector.multi_reduction <add>, %2, %cst [2] : vector<1x16x32xf32> to vector<1x16xf32>
    %4 = vector.shape_cast %3 : vector<1x16xf32> to vector<1x16x1xf32>
    %5 = arith.mulf %1, %1 : vector<1x32x16xf32>
    %cst_5 = arith.constant dense<0.000000e+00> : vector<1x16xf32>
    %6 = vector.multi_reduction <add>, %5, %cst_5 [1] : vector<1x32x16xf32> to vector<1x16xf32>
    %7 = vector.shape_cast %6 : vector<1x16xf32> to vector<1x1x16xf32>
    "tpu.trace_start"() <{level = 10 : i32, message = "gmd,gdn->gmn"}> : () -> ()
    %cst_6 = arith.constant dense<0.000000e+00> : vector<1x16x16xf32>
    %8 = tpu.matmul %0, %1, %cst_6 {dimension_numbers = #tpu.dot_dimension_numbers<[2], [1], [1], [2], [0, 0, 0, 1, 1, 2], [0], [0]>} : vector<1x16x32xf32>, vector<1x32x16xf32>, vector<1x16x16xf32> -> vector<1x16x16xf32>
    "tpu.trace_stop"() : () -> ()
    %9 = math.rsqrt %4 : vector<1x16x1xf32>
    %10 = math.rsqrt %7 : vector<1x1x16xf32>
    %11 = vector.broadcast %9 : vector<1x16x1xf32> to vector<1x16x16xf32>
    %12 = arith.mulf %8, %11 : vector<1x16x16xf32>
    %13 = vector.broadcast %10 : vector<1x1x16xf32> to vector<1x16x16xf32>
    %14 = arith.mulf %12, %13 : vector<1x16x16xf32>
    %15 = arith.mulf %4, %9 : vector<1x16x1xf32>
    %16 = arith.mulf %7, %10 : vector<1x1x16xf32>
    %17 = vector.broadcast %15 : vector<1x16x1xf32> to vector<1x16x16xf32>
    %18 = vector.broadcast %16 : vector<1x1x16xf32> to vector<1x16x16xf32>
    %19 = arith.mulf %17, %18 : vector<1x16x16xf32>
    %c0_7 = arith.constant 0 : index
    %20 = memref.load %arg3[%c0_7] : memref<3xf32, #tpu.memory_space<smem>>
    %21 = vector.broadcast %20 : f32 to vector<1x16x16xf32>
    %22 = arith.mulf %14, %21 : vector<1x16x16xf32>
    %c0_8 = arith.constant 0 : index
    %23 = memref.load %arg4[%c0_8] : memref<3xf32, #tpu.memory_space<smem>>
    %24 = vector.broadcast %23 : f32 to vector<1x16x16xf32>
    %25 = arith.addf %22, %24 : vector<1x16x16xf32>
    %26 = arith.mulf %25, %14 : vector<1x16x16xf32>
    %c1 = arith.constant 1 : index
    %27 = memref.load %arg3[%c1] : memref<3xf32, #tpu.memory_space<smem>>
    %28 = vector.broadcast %27 : f32 to vector<1x16x16xf32>
    %29 = arith.mulf %26, %28 : vector<1x16x16xf32>
    %c1_9 = arith.constant 1 : index
    %30 = memref.load %arg4[%c1_9] : memref<3xf32, #tpu.memory_space<smem>>
    %31 = vector.broadcast %30 : f32 to vector<1x16x16xf32>
    %32 = arith.addf %29, %31 : vector<1x16x16xf32>
    %33 = arith.mulf %32, %14 : vector<1x16x16xf32>
    %c2 = arith.constant 2 : index
    %34 = memref.load %arg3[%c2] : memref<3xf32, #tpu.memory_space<smem>>
    %35 = vector.broadcast %34 : f32 to vector<1x16x16xf32>
    %36 = arith.mulf %33, %35 : vector<1x16x16xf32>
    %c2_10 = arith.constant 2 : index
    %37 = memref.load %arg4[%c2_10] : memref<3xf32, #tpu.memory_space<smem>>
    %38 = vector.broadcast %37 : f32 to vector<1x16x16xf32>
    %39 = arith.addf %36, %38 : vector<1x16x16xf32>
    %40 = arith.mulf %39, %19 : vector<1x16x16xf32>
    %c0_11 = arith.constant 0 : index
    %c0_12 = arith.constant 0 : index
    %c0_13 = arith.constant 0 : index
    %41 = vector.load %arg7[%c0_11, %c0_12, %c0_13] : memref<1x16x16xf32, #tpu.memory_space<vmem>>, vector<1x16x16xf32>
    tpu.vector_store %arg7[%c0_11, %c0_12, %c0_13], %40 {strides = array<i32>} : memref<1x16x16xf32, #tpu.memory_space<vmem>>, vector<1x16x16xf32>,
    return
  }
  func.func @transform_0(%arg0: i32, %arg1: i32, %arg2: i32) -> i32 {
    %c0_i32 = arith.constant 0 : i32
    %c0_i32_0 = arith.constant 0 : i32
    return %c0_i32 : i32
  }
  func.func @transform_1(%arg0: i32, %arg1: i32, %arg2: i32) -> i32 {
    %c0_i32 = arith.constant 0 : i32
    %c0_i32_0 = arith.constant 0 : i32
    return %c0_i32 : i32
  }
  func.func @transform_2(%arg0: i32, %arg1: i32, %arg2: i32) -> (i32, i32, i32) {
    %c0_i32 = arith.constant 0 : i32
    %c0_i32_0 = arith.constant 0 : i32
    return %arg0, %arg1, %c0_i32 : i32, i32, i32
  }
  func.func @transform_3(%arg0: i32, %arg1: i32, %arg2: i32) -> (i32, i32, i32) {
    %c0_i32 = arith.constant 0 : i32
    %c0_i32_0 = arith.constant 0 : i32
    return %arg0, %c0_i32, %arg2 : i32, i32, i32
  }
  func.func @transform_4(%arg0: i32, %arg1: i32, %arg2: i32) -> (i32, i32, i32) {
    %c0_i32 = arith.constant 0 : i32
    return %arg0, %arg1, %arg2 : i32, i32, i32
  }
}

</mosaic_0001>

<bundles_post_ra>
// kernel: tpu_custom_call.1
= control target key start
LH: loop header
LB: loop body
LE: loop exit
PB: predicated region body
PF: predicated region fallthrough
CT: control target
= control target key end

     0   :  { %9 = vsyncpa [#allocation4], 0  ;;  %s1047_s0 = inlined_call_operand.vmem [shape: f32[3], index: 0, kind: input, shape index: {}]   ;;  %s1048_s1 = inlined_call_operand.vmem [shape: f32[3], index: 1, kind: input, shape index: {}]   ;;  %s1049_s2 = inlined_call_operand.vmem [shape: f32[2,16,32], index: 2, kind: input, shape index: {}]   ;;  %s1050_s3 = inlined_call_operand.vmem [shape: f32[2,32,16], index: 3, kind: input, shape index: {}]   ;;  %s1051_s4 = inlined_call_operand.hbm [shape: f32[2,16,16], index: 4, kind: output, shape index: {}]  }
   0x1   :  { %10 = vsyncpa [#allocation6], 0 }
   0x2   :  { %11 = vsyncpa [#allocation3], 0 }
   0x3   :  { %13 = vsyncpa [#allocation3 + $0x1], 0  ;;  %s877_s15 = smov 0   ;;  %s879_s16 = smov 0  }
   0x4   :  { %s881_s17 = smov 0   ;;  %s883_s18 = smov 0  }
   0x5   :  { %s885_s19 = smov 0   ;;  %s887_s20 = smov 0  }
   0x6 LB: > { %s592_s21 = sadd.s32 4294967295, %s845_s20   ;;  %s593_s22 = sadd.s32 4294967294, %s845_s20   ;;  %s845_s20 = sphi %s887_s20, %s19_s20   ;;  %s841_s19 = sphi %s885_s19, %s1069_s19   ;;  %s837_s18 = sphi %s883_s18, %s1068_s18   ;;  %s833_s17 = sphi %s881_s17, %s1067_s17   ;;  %s829_s16 = sphi %s879_s16, %s1066_s16   ;;  %s825_s15 = sphi %s877_s15, %s1065_s15  }
   0x7   : > { %s38_s23 = sadd.s32 1, %s841_s19  ;;  %s147_s24 = sadd.s32 1, %s833_s17 }
   0x8   : > { %p40_p0 = scmp.ge.s32.totalorder %s38_s23, 2  ;;  %p157_p1 = scmp.ne.s32.totalorder %s833_s17, %s829_s16 }
   0x9   : > { %p158_p2 = scmp.eq.s32.totalorder %s592_s21, 1  ;;  %p163_p3 = scmp.ne.s32.totalorder %s829_s16, %s825_s15 }
   0xa   : > { %s1071_s23 = smov (%p40_p0, %s38_s23), 0  ;;  %p164_p5 = scmp.eq.s32.totalorder %s593_s22, 1 }
   0xb   : > { %p917_p4 = por %p158_p2, %p157_p1  ;;  %s140_s26 = ssub.s32 %s841_s19, %s1071_s23 }
   0xc   : > { %p594_p6 = scmp.ge.s32.totalorder %s845_s20, 1  ;;  %p145_p7 = scmp.eq.s32.totalorder %s140_s26, 0 }
   0xd   : > { %s1056_s25 = scalar_select %p917_p4, 1, 0 }
   0xe   : > { %p924_p8 = por %p164_p5, %p163_p3  ;;  %p171_p9 = scmp.lt.s32.totalorder %s845_s20, 3 }
   0xf   : > { %s930_s28 = scalar_select %p145_p7, %s833_s17, %s147_s24  }
  0x10   : > { %s1057_s27 = scalar_select %p924_p8, 1, 0 }
  0x11   : > { %p932_p10 = pnand %p594_p6, %p171_p9  ;;  %p936_p11 = scmp.eq.s32.totalorder %s592_s21, 0 }
  0x12   : > { %s184_s7 = sshll.u32 %s1047_s0, 4  ;;  %s195_s10 = sshll.u32 %s1048_s1, 4  ;;  %s185_s7 = int_to_ptr.vmem [resolvable:$true] %s184_s7  ;;  %s196_s10 = int_to_ptr.vmem [resolvable:$true] %s195_s10 }
  0x13   : > { %s1058_s29 = scalar_select %p932_p10, 1, 0 }
  0x14   : > { %s1059_s30 = scalar_select %p936_p11, 1, 0 }
  0x15   : > { %p655_p12 = pneg %p932_p10  ;;  %s729_s12 = scalar_lea.vmem %s185_s7, 16 }
  0x16   : > { %p730_p0 = scmp.ne.s32.totalorder %s185_s7, %s729_s12  ;;  %p737_p5 = scmp.lt.s32.totalorder %s185_s7, %s185_s7 }
  0x17   : > { %p950_p13 = pnand %p936_p11, %p655_p12  ;;  %p738_p6 = scmp.lt.s32.totalorder %s729_s12, %s729_s12 }
  0x19   : > { %p731_p1 = pneg %p950_p13  ;;  %p739_p7 = por %p738_p6, %p737_p5 }
  0x1b   : > { %p732_p2 = pnand %p731_p1, %p730_p0 }
  0x1d   : > { %p733_p3 = pneg %p732_p2 }
  0x1f   : > { %p740_p9 = pnand %p739_p7, %p733_p3 }
  0x21   : > { %743 = shalt.err (!%p740_p9)
}
  0x22   : > { %s847_s13 = smov [#allocation2]   ;;  %s744_s14 = scalar_lea.vmem %s196_s10, 16 }
  0x23   : > { %658 = dma.vmem_to_smem (!%p950_p13), %s185_s7, 16, %s847_s13, [#allocation4]  }
  0x24   : > { %p745_p12 = scmp.ne.s32.totalorder %s196_s10, %s744_s14  ;;  %p752_p11 = scmp.lt.s32.totalorder %s196_s10, %s196_s10 }
  0x25   : > { %p753_p10 = scmp.lt.s32.totalorder %s744_s14, %s744_s14 }
  0x26   : > { %p747_p8 = pnand %p745_p12, %p731_p1 }
  0x27   : > { %p754_p0 = por %p753_p10, %p752_p11 }
  0x28   : > { %p748_p4 = pneg %p747_p8 }
  0x2a   : > { %p755_p2 = pnand %p754_p0, %p748_p4 }
  0x2c   : > { %758 = shalt.err (!%p755_p2)
}
  0x2d   : > { %s848_s21 = smov [#allocation5]   ;;  %p1061_p3 = scmp.ne.s32.totalorder %s1058_s29, 0 }
  0x2e   : > { %661 = dma.vmem_to_smem (!%p950_p13), %s196_s10, 16, %s848_s21, [#allocation6]  }
  0x2f   : > { %232 = sbr.rel (%p1061_p3) target bundleno = 326 (0x146), region = 36  ;;  %p1062_p5 = scmp.ne.s32.totalorder (!%p1061_p3), %s1059_s30, 0 }
  0x36   : > { %812 = dma.done.wait (%p1062_p5), [#allocation4], 16  }
  0x37   : > { %814 = vsyncadd (%p1062_p5), [#allocation4], 4294967280 }
  0x38   : > { %816 = dma.done.wait (%p1062_p5), [#allocation6], 16  }
  0x39   : > { %818 = vsyncadd (%p1062_p5), [#allocation6], 4294967280 }
  0x3a   : > { %242 = sfence }
  0x3b   : > { %p276_p4 = scmp.lt.s32.totalorder %s837_s18, 1  ;;  %vm302_vm0 = vcmask 261120   ;;  %vm313_vm1 = vcmask 130048   ;;  %s420_s30 = sld [smem:[#allocation2]] }
  0x3c   : > { %s424_s10 = sld [smem:[#allocation5]]  ;;  %s608_s11 = sld [smem:[#allocation2 + $0x1]] }
  0x3d   : > { %s277_s22 = scalar_select %p276_p4, %s837_s18, 1 }
  0x3e   : > { %s609_s12 = sld [smem:[#allocation5 + $0x1]]  ;;  %s610_s13 = sld [smem:[#allocation2 + $0x2]] }
  0x3f   : > { %s618_s24 = sshll.u32 %s277_s22, 5  ;;  %s617_s26 = sshll.u32 %s277_s22, 4 }
  0x40   : > { %s292_s6 = scalar_lea.vmem %s1050_s3, %s618_s24  ;;  %s283_s9 = scalar_lea.vmem %s1049_s2, %s617_s26 }
  0x41   : > { %v296_v0 = vld [vmem:[%s292_s6] sm:$0xff]  ;;  %v297_v1 = vld [vmem:[%s292_s6 + $0x8] sm:$0xff]  ;;  %v298_v2 = vld [vmem:[%s292_s6 + $0x10] sm:$0xff]  ;;  %v421_v37 = vstv %s420_s30  ;;  %s611_s14 = sld [smem:[#allocation5 + $0x2]]  ;;  %s272_s21 = sand.u32 1, %s829_s16  }
  0x42   : > { %v309_v3 = vmul.f32 %v296_v0, %v296_v0  ;;  %v310_v4 = vmul.f32 %v297_v1, %v297_v1  ;;  %v637_v5 = vpack.c.bf16 %v297_v1, %v296_v0  ;;  %v299_v6 = vld [vmem:[%s292_s6 + $0x18] sm:$0xff]  ;;  %v311_v7 = vmul.f32 %v298_v2, %v298_v2  ;;  %v294_v8 = vld [vmem:[%s283_s9] sm:$0xff]  ;;  %v295_v9 = vld [vmem:[%s283_s9 + $0x8] sm:$0xff]  ;;  %s601_s22 = sshll.u32 %s272_s21, 4  ;;  %s619_s24 = sshll.u32 %s837_s18, 8 }
  0x43   : > { %v312_v10 = vmul.f32 %v299_v6, %v299_v6  ;;  %v641_v11 = vpack.c.bf16 %v299_v6, %v298_v2  ;;  %v300_v12 = vmul.f32 %v294_v8, %v294_v8  ;;  %634 = vmatprep.mubr.msk.f32.mxu0 %vm302_vm0, %v294_v8  ;;  %v301_v13 = vmul.f32 %v295_v9, %v295_v9  ;;  %s274_s26 = scalar_lea.vmem [#allocation7], %s601_s22  ;;  %s993_s7 = scalar_lea.hbm %s1051_s4, %s619_s24 }
  0x44   : > { %v314_v14 = vsel %vm313_vm1, %v309_v3, 0.0  ;;  %v315_v15 = vsel %vm313_vm1, %v310_v4, 0.0  ;;  %638 = vmatprep.subr.bf16.mxu0 %v637_v5  ;;  %v317_v16 = vsel %vm313_vm1, %v311_v7, 0.0  ;;  %v425_v40 = vstv %s424_s10  ;;  %s469_s29 = sshll.u32 %s274_s26, 4  ;;  %s1001_s18 = scalar_lea.sflag [#allocation3], %s272_s21  ;;  %s995_s29 = int_to_ptr.vmem [resolvable:$true] %s469_s29 }
  0x45   : > { %v316_v17 = vadd.f32 %v315_v15, %v314_v14  ;;  %640 = vmatpush3.bf16.msra.mxu0 %v637_v5  ;;  %v303_v18 = vsel %vm302_vm0, %v300_v12, 0.0  ;;  %v319_v19 = vsel %vm313_vm1, %v312_v10, 0.0  ;;  %v306_v21 = vsel %vm302_vm0, %v301_v13, 0.0  ;;  %s759_s8 = scalar_lea.vmem %s995_s29, 256  ;;  %p1063_p10 = scmp.ne.s32.totalorder %s1056_s25, 0 }
  0x46   : > { %642 = vmatprep.subr.bf16.mxu0 %v641_v11  ;;  %304 = vadd.xlane.f32.xlu0 %v303_v18  ;;  %v431_v45 = vstv %s608_s11  ;;  %v435_v48 = vstv %s609_s12  ;;  %v441_v53 = vstv %s610_s13  ;;  %p760_p8 = scmp.ne.s32.totalorder %s995_s29, %s759_s8  ;;  %s849_s9 = smov [#allocation7]  }
  0x47   : > { %v318_v20 = vadd.f32 %v317_v16, %v316_v17  ;;  %v445_v59 = vstv %s611_s14  ;;  %s763_s30 = sshll.u32 %s849_s9, 4  ;;  %s764_s30 = int_to_ptr.vmem [resolvable:$false] %s763_s30 }
  0x48   : > { %p761_p11 = pnand %p760_p8, %p1063_p10  ;;  %s765_s10 = scalar_lea.vmem %s764_s30, 512 }
  0x49   : > { %v320_v22 = vadd.f32 %v319_v19, %v318_v20  ;;  %644 = vmatpush3.bf16.msra.mxu0 %v641_v11  ;;  %p766_p1 = scmp.lt.s32.totalorder %s995_s29, %s764_s30  ;;  %p767_p6 = scmp.lt.s32.totalorder %s765_s10, %s759_s8 }
  0x4a   : > { %307 = vadd.xlane.f32.xlu0 %v306_v21  ;;  %p762_p13 = pneg %p761_p11 }
  0x4b   : > { %v321_v23 = vrot.slane %v320_v22, 4  ;;  %p768_p7 = por %p767_p6, %p766_p1 }
  0x4c   : > { %635 = vmatmul.mubr.msk.f32.vlgmr.msra.gmra.mrb[0].mxu0 %vm302_vm0, %v295_v9 }
  0x4d   : > { %v322_v24 = vadd.f32 %v321_v23, %v320_v22  ;;  %p769_p9 = pnand %p768_p7, %p762_p13 }
  0x4f   : > { %v323_v25 = vrot.slane %v322_v24, 2 }
  0x51   : > { %v324_v26 = vadd.f32 %v323_v25, %v322_v24 }
  0x53   : > { %v325_v28 = vrot.slane %v324_v26, 1 }
  0x55   : > { %v326_v30 = vadd.f32 %v325_v28, %v324_v26 }
  0xd3   : > { %v305_v27 = vpop.xlane.xlu0 %304 }
  0xd7   : > { %v308_v29 = vpop.xlane.xlu0 %307 }
  0xd8   : > { %723 = vrsqrt.f32 %v308_v29 }
  0xd9   : > { %725 = vrsqrt.f32 %v305_v27 }
  0xda   : > { %727 = vrsqrt.f32 %v326_v30 }
  0xe2   : > { %v724_v31 = vpop.eup %723 }
  0xe3   : > { %v726_v33 = vpop.eup %725  ;;  %v416_v55 = vmul.f32 %v724_v31, %v308_v29 }
  0xe4   : > { %v728_v36 = vpop.eup %727  ;;  %v415_v58 = vmul.f32 %v726_v33, %v305_v27 }
  0xe5   : > { %v417_v57 = vmul.f32 %v728_v36, %v326_v30 }
  0xe7   : > { %v419_v63 = vmul.f32 %v417_v57, %v416_v55  ;;  %v418_v1 = vmul.f32 %v417_v57, %v415_v58 }
 0x11f   : > { %v636_v32 = vpop.f32.mrb[0].mxu0 }
 0x120   : > { %v412_v34 = vmul.f32 %v724_v31, %v636_v32  ;;  %v399_v35 = vpop.f32.mrb[1].mxu0 }
 0x121   : > { %v411_v38 = vmul.f32 %v726_v33, %v399_v35 }
 0x122   : > { %v414_v39 = vmul.f32 %v728_v36, %v412_v34 }
 0x123   : > { %v413_v41 = vmul.f32 %v728_v36, %v411_v38 }
 0x124   : > { %v423_v42 = vmul.f32 %v421_v37, %v414_v39 }
 0x125   : > { %v422_v43 = vmul.f32 %v421_v37, %v413_v41 }
 0x126   : > { %v427_v44 = vadd.f32 %v425_v40, %v423_v42 }
 0x127   : > { %v426_v46 = vadd.f32 %v425_v40, %v422_v43 }
 0x128   : > { %v429_v47 = vmul.f32 %v427_v44, %v414_v39 }
 0x129   : > { %v428_v49 = vmul.f32 %v426_v46, %v413_v41 }
 0x12a   : > { %v433_v50 = vmul.f32 %v431_v45, %v429_v47 }
 0x12b   : > { %v432_v51 = vmul.f32 %v431_v45, %v428_v49 }
 0x12c   : > { %v437_v52 = vadd.f32 %v435_v48, %v433_v50 }
 0x12d   : > { %v436_v54 = vadd.f32 %v435_v48, %v432_v51 }
 0x12e   : > { %v439_v56 = vmul.f32 %v437_v52, %v414_v39 }
 0x12f   : > { %v438_v60 = vmul.f32 %v436_v54, %v413_v41 }
 0x130   : > { %v443_v61 = vmul.f32 %v441_v53, %v439_v56 }
 0x131   : > { %v442_v62 = vmul.f32 %v441_v53, %v438_v60 }
 0x132   : > { %v447_v0 = vadd.f32 %v445_v59, %v443_v61 }
 0x133   : > { %v446_v2 = vadd.f32 %v445_v59, %v442_v62 }
 0x134   : > { %v449_v3 = vmul.f32 %v447_v0, %v419_v63 }
 0x135   : > { %v448_v4 = vmul.f32 %v446_v2, %v418_v1 }
 0x136   : > { %451 = vst.msk [vmem:[%s274_s26 + $0x8] sm:$0xff] %vm313_vm1, %v449_v3 }
 0x137   : > { %450 = vst.msk [vmem:[%s274_s26] sm:$0xff] %vm313_vm1, %v448_v4 }
 0x138   : > { %772 = shalt.err (!%p769_p9)
}
 0x139   : > { %s773_s11 = scalar_lea.hbm %s993_s7, 256  ;;  %s777_s14 = scalar_lea.hbm %s1051_s4, 512 }
 0x13a   : > { %p774_p12 = scmp.ne.s32.totalorder %s993_s7, %s773_s11  ;;  %p778_p3 = scmp.lt.u32.totalorder %s993_s7, %s1051_s4 }
 0x13b   : > { %p779_p5 = scmp.lt.u32.totalorder %s777_s14, %s773_s11  ;;  %p781_p8 = scmp.lt.u32.totalorder %s773_s11, %s993_s7 }
 0x13c   : > { %p775_p0 = pnand %p774_p12, %p1063_p10 }
 0x13d   : > { %p780_p4 = por %p779_p5, %p778_p3 }
 0x13e   : > { %p776_p2 = pneg %p775_p0 }
 0x13f   : > { %p782_p11 = por %p781_p8, %p780_p4 }
 0x141   : > { %p783_p13 = pnand %p782_p11, %p776_p2 }
 0x143   : > { %786 = shalt.err (!%p783_p13)
}
 0x144   : > { %s850_s24 = smov 128   ;;  %s851_s26 = smov 8  }
 0x145   : > { %653 = dma.vmem_to_hbm [thread:$0]  (%p1063_p10), %s995_s29, 256, %s993_s7, %s1001_s18, %s850_s24, %s850_s24, %s851_s26  }
 0x146 PF: > { %p670_p1 = scmp.ge.s32.totalorder %s845_s20, 2  ;;  %s484_s5 = sand.u32 1, %s825_s15  }
 0x147   : > { %p1064_p6 = scmp.ne.s32.totalorder %s1057_s27, 0  ;;  %s485_s6 = scalar_lea.sflag [#allocation3], %s484_s5 }
 0x149   : > { %p663_p7 = pnand %p670_p1, %p1064_p6 }
 0x14b   : > { %820 = dma.done.wait (!%p663_p7), %s485_s6, 256  }
 0x14c   : > { %822 = vsyncadd (!%p663_p7), %s485_s6, 4294967040  ;;  %s19_s20 = sadd.s32 1, %s845_s20   ;;  %s1065_s15 = smov %s829_s16 }
 0x14d   : > { %p16_p9 = scmp.ge.s32.totalorder %s19_s20, 4   ;;  %s1066_s16 = smov %s833_s17 }
 0x14e   : > { %s1067_s17 = smov %s930_s28  ;;  %s1068_s18 = smov %s841_s19 }
 0x14f   : > { %s1069_s19 = smov %s1071_s23  ;;  %18 = sbr.rel (!%p16_p9) target bundleno = 6 (0x6), region = 83 }
 0x156   :  { %490 = vsyncpa [#allocation3], 1 }
 0x157   :  { %492 = vsyncpa [#allocation3 + $0x1], 1 }
 0x158   :  { %493 = vsyncpa [#allocation4], 1 }
 0x159   :  { %495 = vsyncpa [#allocation4 + $0x1], 1 }
 0x15a   :  { %496 = vsyncpa [#allocation6], 1 }

</bundles_post_ra>
